<compile_context>
chip_gen: v6e
topology: v6e:2x2x1
jax: 0.10.0
libtpu: 0.0.40
codegen_flags: <defaults>
</compile_context>

<pallas_src>
import functools

import jax
import jax.numpy as jnp
from jax.experimental import pallas as pl
from jax.experimental.pallas import tpu as pltpu


def _round_up(v, m):
    return ((v + m - 1) // m) * m


def _club_infonce_kernel(n_total, tile_i, tile_j, num_hidden, activation, *refs):
    # refs = (hy, hx, [w_h, b_h]*num_hidden, w_last, o_ref)
    hy_ref, hx_ref = refs[0], refs[1]
    hidden_refs = refs[2:2 + 2 * num_hidden]
    w_last_ref = refs[2 + 2 * num_hidden]
    o_ref = refs[-1]

    act = jnp.tanh if activation == "tanh" else (lambda v: jnp.maximum(v, 0.0))

    bi = pl.program_id(0)
    bj = pl.program_id(1)

    cdt = hy_ref.dtype                          # compute dtype of MXU operands
    ti, h_dim = hy_ref.shape                    # (TI, Hpad)
    tj = hx_ref.shape[0]                        # (TJ, Hpad)

    # Pairwise first-layer activation in f32:  h[i, j, :] = act(hy[i] + hx[j]).
    h32 = act(hy_ref[...].astype(jnp.float32)[:, None, :] +
              hx_ref[...].astype(jnp.float32)[None, :, :])          # (TI, TJ, H)

    # Hidden tail layers as flat 2-D MXU matmuls (full M-dim fill).
    h = h32.reshape(ti * tj, h_dim).astype(cdt)                      # (TI*TJ, H)
    for li in range(num_hidden):
        w = hidden_refs[2 * li][...]                                 # (H, H), cdt
        b = hidden_refs[2 * li + 1][...].astype(jnp.float32)         # (1, H), f32
        z = jnp.dot(h, w, preferred_element_type=jnp.float32) + b
        h = act(z).astype(cdt)

    # Final (H -> 1) layer: multiply + lane reduce -> lane-dense (TI, TJ) tile.
    w_last = w_last_ref[...].astype(jnp.float32)                     # (1, H)
    h3 = h.astype(jnp.float32).reshape(ti, tj, h_dim)
    scores = jnp.sum(h3 * w_last[None, :, :], axis=-1)               # (TI, TJ)

    # Mask padded rows/cols (mask BEFORE summing), extract diagonal for T0.
    i_ids = jax.lax.broadcasted_iota(jnp.int32, (ti, tj), 0) + bi * tile_i
    j_ids = jax.lax.broadcasted_iota(jnp.int32, (ti, tj), 1) + bj * tile_j
    valid = jnp.logical_and(i_ids < n_total, j_ids < n_total)
    s_valid = jnp.where(valid, scores, 0.0)

    t1_part = jnp.sum(s_valid)                                       # all pairs
    t0_part = jnp.sum(jnp.where(i_ids == j_ids, s_valid, 0.0))       # diagonal

    # Lane-dense per-block partial tile: [0,0]=T1 partial, [0,1]=T0 partial.
    r8 = jax.lax.broadcasted_iota(jnp.int32, (8, 128), 0)
    c8 = jax.lax.broadcasted_iota(jnp.int32, (8, 128), 1)
    tile = jnp.where(jnp.logical_and(r8 == 0, c8 == 0), t1_part,
                     jnp.where(jnp.logical_and(r8 == 0, c8 == 1), t0_part, 0.0))

    # Accumulate over the j ("arbitrary") axis; output block is i-resident.
    @pl.when(bj == 0)
    def _():
        o_ref[0] = tile

    @pl.when(bj > 0)
    def _():
        o_ref[0] = o_ref[0] + tile


def club_infonce_forward(x, y, params, *, activation="relu",
                         tile_i=128, tile_j=128,
                         compute_dtype=jnp.float32):
    """params: list of (W, b) with W shaped (in, out).  Returns scalar f32.

    compute_dtype: jnp.float32 (default, exact; use on v5e) or jnp.bfloat16
    (v6e/v7x: halves DMA + activation footprint, f32 accumulation kept).
    """
    n = x.shape[0]
    b_dim = y.shape[1]
    num_hidden = len(params) - 2

    w0, b0 = params[0]
    w_last, b_last = params[-1]
    h_dim = w0.shape[1]
    h_pad = _round_up(max(h_dim, 128), 128)      # lane-align the hidden dim

    # ---- layer-0 precompute in the wrapper (tiny vs the pairwise work) ----
    hy = y.astype(jnp.float32) @ w0[:b_dim].astype(jnp.float32) + b0.astype(jnp.float32)
    hx = x.astype(jnp.float32) @ w0[b_dim:].astype(jnp.float32)

    # ---- tiling over the (i, j) score matrix ----
    n_r8 = _round_up(n, 8)
    ti = min(_round_up(tile_i, 8), n_r8)
    tj = min(_round_up(tile_j, 8), n_r8)
    n_pad_i = _round_up(n, ti)
    n_pad_j = _round_up(n, tj)
    nblk_i = n_pad_i // ti
    nblk_j = n_pad_j // tj

    # Zero-pad rows (no garbage enters compute; padded rows masked in-kernel)
    # and zero-pad the hidden dim to h_pad lanes (exactly neutral through the MLP).
    hy_p = jnp.zeros((n_pad_i, h_pad), jnp.float32).at[:n, :h_dim].set(hy).astype(compute_dtype)
    hx_p = jnp.zeros((n_pad_j, h_pad), jnp.float32).at[:n, :h_dim].set(hx).astype(compute_dtype)

    flat_inputs = [hy_p, hx_p]
    in_specs = [
        pl.BlockSpec((ti, h_pad), lambda i, j: (i, 0)),      # hy: tiled over i
        pl.BlockSpec((tj, h_pad), lambda i, j: (j, 0)),      # hx: tiled over j
    ]
    for w, b in params[1:-1]:
        w_p = jnp.zeros((h_pad, h_pad), jnp.float32).at[:h_dim, :h_dim].set(w).astype(compute_dtype)
        b_p = jnp.zeros((1, h_pad), jnp.float32).at[0, :h_dim].set(b)
        flat_inputs += [w_p, b_p]
        in_specs += [pl.BlockSpec((h_pad, h_pad), lambda i, j: (0, 0)),
                     pl.BlockSpec((1, h_pad), lambda i, j: (0, 0))]
    w_last_p = jnp.zeros((1, h_pad), jnp.float32).at[0, :h_dim].set(w_last[:, 0])
    flat_inputs.append(w_last_p)
    in_specs.append(pl.BlockSpec((1, h_pad), lambda i, j: (0, 0)))

    kernel = functools.partial(_club_infonce_kernel, n, ti, tj, num_hidden, activation)

    partials = pl.pallas_call(
        kernel,
        out_shape=jax.ShapeDtypeStruct((nblk_i, 8, 128), jnp.float32),
        grid=(nblk_i, nblk_j),
        in_specs=in_specs,
        out_specs=pl.BlockSpec((1, 8, 128), lambda i, j: (i, 0, 0)),
        compiler_params=pltpu.CompilerParams(
            dimension_semantics=("parallel", "arbitrary"),   # i parallel, j reduce
            vmem_limit_bytes=48 * 1024 * 1024),               # v7x-safe (<64 MiB)
    )(*flat_inputs)

    t1_sum = jnp.sum(partials[:, 0, 0])
    t0_sum = jnp.sum(partials[:, 0, 1])
    n_f = jnp.float32(n)
    b_last_s = b_last.reshape(()).astype(jnp.float32)         # constant offset,
    t0_mean = t0_sum / n_f + b_last_s                         # folded analytically
    t1_mean = t1_sum / (n_f * n_f) + b_last_s
    return -(t0_mean - t1_mean)


def init_mlp_params(key, dim, hidden_dim, output_dim, layers):
    """Deterministic init matching mlp(dim, hidden, out, layers, act) layer sizes."""
    dims = [dim] + [hidden_dim] * (layers + 1) + [output_dim]
    params = []
    for i in range(len(dims) - 1):
        key, kw, kb = jax.random.split(key, 3)
        bound = 1.0 / (dims[i] ** 0.5)
        w = jax.random.uniform(kw, (dims[i], dims[i + 1]), jnp.float32, -bound, bound)
        b = jax.random.uniform(kb, (dims[i + 1],), jnp.float32, -bound, bound)
        params.append((w, b))
    return params


def reference_forward(x, y, params, activation="relu"):
    """Pure-JAX reference replicating CLUBInfoNCECritic.forward semantics."""
    act = jnp.tanh if activation == "tanh" else jax.nn.relu

    def f(z):
        h = z
        for li, (w, b) in enumerate(params):
            h = h @ w + b
            if li != len(params) - 1:
                h = act(h)
        return h

    n = y.shape[0]
    t0 = f(jnp.concatenate([y, x], axis=-1))                       # (N, 1)
    y_tile = jnp.broadcast_to(y[:, None, :], (n, n, y.shape[1])).reshape(n * n, -1)
    x_tile = jnp.broadcast_to(x[None, :, :], (n, n, x.shape[1])).reshape(n * n, -1)
    t1 = f(jnp.concatenate([y_tile, x_tile], axis=-1))             # (N*N, 1)
    return -(jnp.mean(t0) - jnp.mean(t1))


if __name__ == "__main__":
    N, A_dim, B_dim, hidden_dim, layers = 8, 6, 10, 32, 2  # activation='relu'

    key = jax.random.PRNGKey(0)
    kx, ky, kp = jax.random.split(key, 3)
    x_samples = jax.random.normal(kx, (N, A_dim), jnp.float32)
    y_samples = jax.random.normal(ky, (N, B_dim), jnp.float32)
    params = init_mlp_params(kp, A_dim + B_dim, hidden_dim, 1, layers)

    out = club_infonce_forward(x_samples, y_samples, params, activation="relu")
    out = jax.block_until_ready(out)

    ref = reference_forward(x_samples, y_samples, params, activation="relu")
    assert jnp.allclose(out, ref, rtol=1e-5, atol=1e-5), (out, ref)
    print("KERNEL_OK")
</pallas_src>

<mosaic_0001>
module attributes {stable_mosaic.version = 11 : i64} {
  func.func @_club_infonce_kernel(%arg0: i32, %arg1: i32, %arg2: memref<8x128xf32, #tpu.memory_space<vmem>>, %arg3: memref<8x128xf32, #tpu.memory_space<vmem>>, %arg4: memref<128x128xf32, #tpu.memory_space<vmem>>, %arg5: memref<1x128xf32, #tpu.memory_space<vmem>>, %arg6: memref<128x128xf32, #tpu.memory_space<vmem>>, %arg7: memref<1x128xf32, #tpu.memory_space<vmem>>, %arg8: memref<1x128xf32, #tpu.memory_space<vmem>>, %arg9: memref<1x8x128xf32, #tpu.memory_space<vmem>>) attributes {dimension_semantics = [#tpu.dimension_semantics<parallel>, #tpu.dimension_semantics<arbitrary>], iteration_bounds = array<i64: 1, 1>, scalar_prefetch = 0 : i64, scratch_operands = 0 : i64, tpu.core_type = #tpu.core_type<tc>, window_params = [{transform_indices = @transform_0, window_bounds = array<i64: 8, 128>}, {transform_indices = @transform_1, window_bounds = array<i64: 8, 128>}, {pipeline_mode = #tpu.pipeline_mode<synchronous>, transform_indices = @transform_2, window_bounds = array<i64: 128, 128>}, {pipeline_mode = #tpu.pipeline_mode<synchronous>, transform_indices = @transform_3, window_bounds = array<i64: 1, 128>}, {pipeline_mode = #tpu.pipeline_mode<synchronous>, transform_indices = @transform_4, window_bounds = array<i64: 128, 128>}, {pipeline_mode = #tpu.pipeline_mode<synchronous>, transform_indices = @transform_5, window_bounds = array<i64: 1, 128>}, {pipeline_mode = #tpu.pipeline_mode<synchronous>, transform_indices = @transform_6, window_bounds = array<i64: 1, 128>}, {transform_indices = @transform_7, window_bounds = array<i64: 1, 8, 128>}]} {
    %c0 = arith.constant 0 : index
    %c0_0 = arith.constant 0 : index
    %0 = vector.load %arg2[%c0, %c0_0] : memref<8x128xf32, #tpu.memory_space<vmem>>, vector<8x128xf32>
    %1 = vector.shape_cast %0 : vector<8x128xf32> to vector<8x1x128xf32>
    %c0_1 = arith.constant 0 : index
    %c0_2 = arith.constant 0 : index
    %2 = vector.load %arg3[%c0_1, %c0_2] : memref<8x128xf32, #tpu.memory_space<vmem>>, vector<8x128xf32>
    %3 = vector.shape_cast %2 : vector<8x128xf32> to vector<1x8x128xf32>
    %4 = vector.broadcast %1 : vector<8x1x128xf32> to vector<8x8x128xf32>
    %5 = vector.broadcast %3 : vector<1x8x128xf32> to vector<8x8x128xf32>
    %6 = arith.addf %4, %5 : vector<8x8x128xf32>
    %cst = arith.constant 0.000000e+00 : f32
    %7 = vector.broadcast %cst : f32 to vector<8x8x128xf32>
    %8 = arith.maximumf %6, %7 : vector<8x8x128xf32>
    %9 = vector.shape_cast %8 : vector<8x8x128xf32> to vector<64x128xf32>
    %c0_3 = arith.constant 0 : index
    %c0_4 = arith.constant 0 : index
    %10 = vector.load %arg4[%c0_3, %c0_4] : memref<128x128xf32, #tpu.memory_space<vmem>>, vector<128x128xf32>
    %c0_5 = arith.constant 0 : index
    %c0_6 = arith.constant 0 : index
    %11 = vector.load %arg5[%c0_5, %c0_6] : memref<1x128xf32, #tpu.memory_space<vmem>>, vector<1x128xf32>
    %cst_7 = arith.constant dense<0.000000e+00> : vector<64x128xf32>
    %12 = tpu.matmul %9, %10, %cst_7 {dimension_numbers = #tpu.dot_dimension_numbers<[1], [0], [0], [1], [0, 0, 1, 1], [], []>} : vector<64x128xf32>, vector<128x128xf32>, vector<64x128xf32> -> vector<64x128xf32>
    %13 = vector.broadcast %11 : vector<1x128xf32> to vector<64x128xf32>
    %14 = arith.addf %12, %13 : vector<64x128xf32>
    %cst_8 = arith.constant 0.000000e+00 : f32
    %15 = vector.broadcast %cst_8 : f32 to vector<64x128xf32>
    %16 = arith.maximumf %14, %15 : vector<64x128xf32>
    %c0_9 = arith.constant 0 : index
    %c0_10 = arith.constant 0 : index
    %17 = vector.load %arg6[%c0_9, %c0_10] : memref<128x128xf32, #tpu.memory_space<vmem>>, vector<128x128xf32>
    %c0_11 = arith.constant 0 : index
    %c0_12 = arith.constant 0 : index
    %18 = vector.load %arg7[%c0_11, %c0_12] : memref<1x128xf32, #tpu.memory_space<vmem>>, vector<1x128xf32>
    %cst_13 = arith.constant dense<0.000000e+00> : vector<64x128xf32>
    %19 = tpu.matmul %16, %17, %cst_13 {dimension_numbers = #tpu.dot_dimension_numbers<[1], [0], [0], [1], [0, 0, 1, 1], [], []>} : vector<64x128xf32>, vector<128x128xf32>, vector<64x128xf32> -> vector<64x128xf32>
    %20 = vector.broadcast %18 : vector<1x128xf32> to vector<64x128xf32>
    %21 = arith.addf %19, %20 : vector<64x128xf32>
    %cst_14 = arith.constant 0.000000e+00 : f32
    %22 = vector.broadcast %cst_14 : f32 to vector<64x128xf32>
    %23 = arith.maximumf %21, %22 : vector<64x128xf32>
    %c0_15 = arith.constant 0 : index
    %c0_16 = arith.constant 0 : index
    %24 = vector.load %arg8[%c0_15, %c0_16] : memref<1x128xf32, #tpu.memory_space<vmem>>, vector<1x128xf32>
    %25 = vector.shape_cast %23 : vector<64x128xf32> to vector<8x8x128xf32>
    %26 = vector.shape_cast %24 : vector<1x128xf32> to vector<1x1x128xf32>
    %27 = vector.broadcast %26 : vector<1x1x128xf32> to vector<8x8x128xf32>
    %28 = arith.mulf %25, %27 : vector<8x8x128xf32>
    %cst_17 = arith.constant dense<0.000000e+00> : vector<8x8xf32>
    %29 = vector.multi_reduction <add>, %28, %cst_17 [2] : vector<8x8x128xf32> to vector<8x8xf32>
    %30 = tpu.iota {dimensions = array<i32: 0>} : vector<8x8xi32>
    %c8_i32 = arith.constant 8 : i32
    %31 = arith.muli %arg0, %c8_i32 : i32
    %32 = vector.broadcast %31 : i32 to vector<8x8xi32>
    %33 = arith.addi %30, %32 : vector<8x8xi32>
    %34 = tpu.iota {dimensions = array<i32: 1>} : vector<8x8xi32>
    %c8_i32_18 = arith.constant 8 : i32
    %35 = arith.muli %arg1, %c8_i32_18 : i32
    %36 = vector.broadcast %35 : i32 to vector<8x8xi32>
    %37 = arith.addi %34, %36 : vector<8x8xi32>
    %c8_i32_19 = arith.constant 8 : i32
    %38 = vector.broadcast %c8_i32_19 : i32 to vector<8x8xi32>
    %39 = arith.cmpi slt, %33, %38 : vector<8x8xi32>
    %c8_i32_20 = arith.constant 8 : i32
    %40 = vector.broadcast %c8_i32_20 : i32 to vector<8x8xi32>
    %41 = arith.cmpi slt, %37, %40 : vector<8x8xi32>
    %42 = arith.andi %39, %41 : vector<8x8xi1>
    %cst_21 = arith.constant 0.000000e+00 : f32
    %43 = vector.broadcast %cst_21 : f32 to vector<8x8xf32>
    %44 = arith.select %42, %29, %43 : vector<8x8xi1>, vector<8x8xf32>
    %45 = vector.shape_cast %44 : vector<8x8xf32> to vector<1x8x8xf32>
    %cst_22 = arith.constant dense<0.000000e+00> : vector<1xf32>
    %46 = vector.multi_reduction <add>, %45, %cst_22 [1, 2] : vector<1x8x8xf32> to vector<1xf32>
    %47 = vector.shape_cast %46 : vector<1xf32> to vector<1x1x1xf32>
    %48 = vector.extract %47[0, 0, 0] : f32 from vector<1x1x1xf32>
    %49 = arith.cmpi eq, %33, %37 : vector<8x8xi32>
    %cst_23 = arith.constant 0.000000e+00 : f32
    %50 = vector.broadcast %cst_23 : f32 to vector<8x8xf32>
    %51 = arith.select %49, %44, %50 : vector<8x8xi1>, vector<8x8xf32>
    %52 = vector.shape_cast %51 : vector<8x8xf32> to vector<1x8x8xf32>
    %cst_24 = arith.constant dense<0.000000e+00> : vector<1xf32>
    %53 = vector.multi_reduction <add>, %52, %cst_24 [1, 2] : vector<1x8x8xf32> to vector<1xf32>
    %54 = vector.shape_cast %53 : vector<1xf32> to vector<1x1x1xf32>
    %55 = vector.extract %54[0, 0, 0] : f32 from vector<1x1x1xf32>
    %56 = tpu.iota {dimensions = array<i32: 0>} : vector<8x128xi32>
    %57 = tpu.iota {dimensions = array<i32: 1>} : vector<8x128xi32>
    %c0_i32 = arith.constant 0 : i32
    %58 = vector.broadcast %c0_i32 : i32 to vector<8x128xi32>
    %59 = arith.cmpi eq, %56, %58 : vector<8x128xi32>
    %c0_i32_25 = arith.constant 0 : i32
    %60 = vector.broadcast %c0_i32_25 : i32 to vector<8x128xi32>
    %61 = arith.cmpi eq, %57, %60 : vector<8x128xi32>
    %62 = arith.andi %59, %61 : vector<8x128xi1>
    %c0_i32_26 = arith.constant 0 : i32
    %63 = vector.broadcast %c0_i32_26 : i32 to vector<8x128xi32>
    %64 = arith.cmpi eq, %56, %63 : vector<8x128xi32>
    %c1_i32 = arith.constant 1 : i32
    %65 = vector.broadcast %c1_i32 : i32 to vector<8x128xi32>
    %66 = arith.cmpi eq, %57, %65 : vector<8x128xi32>
    %67 = arith.andi %64, %66 : vector<8x128xi1>
    %cst_27 = arith.constant 0.000000e+00 : f32
    %68 = vector.broadcast %55 : f32 to vector<8x128xf32>
    %69 = vector.broadcast %cst_27 : f32 to vector<8x128xf32>
    %70 = arith.select %67, %68, %69 : vector<8x128xi1>, vector<8x128xf32>
    %71 = vector.broadcast %48 : f32 to vector<8x128xf32>
    %72 = arith.select %62, %71, %70 : vector<8x128xi1>, vector<8x128xf32>
    %c0_i32_28 = arith.constant 0 : i32
    %73 = arith.cmpi eq, %arg1, %c0_i32_28 : i32
    %74 = arith.extui %73 : i1 to i32
    %c0_i32_29 = arith.constant 0 : i32
    %75 = arith.cmpi ne, %74, %c0_i32_29 : i32
    scf.if %75 {
      %c0_32 = arith.constant 0 : index
      %c0_33 = arith.constant 0 : index
      %c0_34 = arith.constant 0 : index
      %79 = vector.load %arg9[%c0_32, %c0_33, %c0_34] : memref<1x8x128xf32, #tpu.memory_space<vmem>>, vector<1x8x128xf32>
      %80 = vector.shape_cast %79 : vector<1x8x128xf32> to vector<8x128xf32>
      %81 = vector.shape_cast %72 : vector<8x128xf32> to vector<1x8x128xf32>
      tpu.vector_store %arg9[%c0_32, %c0_33, %c0_34], %81 {strides = array<i32>} : memref<1x8x128xf32, #tpu.memory_space<vmem>>, vector<1x8x128xf32>,
    } else {
    }
    %c0_i32_30 = arith.constant 0 : i32
    %76 = arith.cmpi sgt, %arg1, %c0_i32_30 : i32
    %77 = arith.extui %76 : i1 to i32
    %c0_i32_31 = arith.constant 0 : i32
    %78 = arith.cmpi ne, %77, %c0_i32_31 : i32
    scf.if %78 {
      %c0_32 = arith.constant 0 : index
      %c0_33 = arith.constant 0 : index
      %c0_34 = arith.constant 0 : index
      %79 = vector.load %arg9[%c0_32, %c0_33, %c0_34] : memref<1x8x128xf32, #tpu.memory_space<vmem>>, vector<1x8x128xf32>
      %80 = vector.shape_cast %79 : vector<1x8x128xf32> to vector<8x128xf32>
      %81 = arith.addf %80, %72 : vector<8x128xf32>
      %c0_35 = arith.constant 0 : index
      %c0_36 = arith.constant 0 : index
      %c0_37 = arith.constant 0 : index
      %82 = vector.load %arg9[%c0_35, %c0_36, %c0_37] : memref<1x8x128xf32, #tpu.memory_space<vmem>>, vector<1x8x128xf32>
      %83 = vector.shape_cast %82 : vector<1x8x128xf32> to vector<8x128xf32>
      %84 = vector.shape_cast %81 : vector<8x128xf32> to vector<1x8x128xf32>
      tpu.vector_store %arg9[%c0_35, %c0_36, %c0_37], %84 {strides = array<i32>} : memref<1x8x128xf32, #tpu.memory_space<vmem>>, vector<1x8x128xf32>,
    } else {
    }
    return
  }
  func.func @transform_0(%arg0: i32, %arg1: i32) -> (i32, i32) {
    %c0_i32 = arith.constant 0 : i32
    %c0_i32_0 = arith.constant 0 : i32
    return %arg0, %c0_i32 : i32, i32
  }
  func.func @transform_1(%arg0: i32, %arg1: i32) -> (i32, i32) {
    %c0_i32 = arith.constant 0 : i32
    %c0_i32_0 = arith.constant 0 : i32
    return %arg1, %c0_i32 : i32, i32
  }
  func.func @transform_2(%arg0: i32, %arg1: i32) -> (i32, i32) {
    %c0_i32 = arith.constant 0 : i32
    %c0_i32_0 = arith.constant 0 : i32
    %c0_i32_1 = arith.constant 0 : i32
    return %c0_i32, %c0_i32_0 : i32, i32
  }
  func.func @transform_3(%arg0: i32, %arg1: i32) -> (i32, i32) {
    %c0_i32 = arith.constant 0 : i32
    %c0_i32_0 = arith.constant 0 : i32
    %c0_i32_1 = arith.constant 0 : i32
    return %c0_i32, %c0_i32_0 : i32, i32
  }
  func.func @transform_4(%arg0: i32, %arg1: i32) -> (i32, i32) {
    %c0_i32 = arith.constant 0 : i32
    %c0_i32_0 = arith.constant 0 : i32
    %c0_i32_1 = arith.constant 0 : i32
    return %c0_i32, %c0_i32_0 : i32, i32
  }
  func.func @transform_5(%arg0: i32, %arg1: i32) -> (i32, i32) {
    %c0_i32 = arith.constant 0 : i32
    %c0_i32_0 = arith.constant 0 : i32
    %c0_i32_1 = arith.constant 0 : i32
    return %c0_i32, %c0_i32_0 : i32, i32
  }
  func.func @transform_6(%arg0: i32, %arg1: i32) -> (i32, i32) {
    %c0_i32 = arith.constant 0 : i32
    %c0_i32_0 = arith.constant 0 : i32
    %c0_i32_1 = arith.constant 0 : i32
    return %c0_i32, %c0_i32_0 : i32, i32
  }
  func.func @transform_7(%arg0: i32, %arg1: i32) -> (i32, i32, i32) {
    %c0_i32 = arith.constant 0 : i32
    %c0_i32_0 = arith.constant 0 : i32
    %c0_i32_1 = arith.constant 0 : i32
    return %arg0, %c0_i32, %c0_i32_0 : i32, i32, i32
  }
}

</mosaic_0001>

<bundles_post_ra>
// kernel: tpu_custom_call.1
= control target key start
LH: loop header
LB: loop body
LE: loop exit
PB: predicated region body
PF: predicated region fallthrough
CT: control target
= control target key end

     0   :  { %12 = vsyncpa [#allocation3], 0  ;;  %s995_s0 = inlined_call_operand.hbm [shape: f32[8,128], index: 0, kind: input, shape index: {}]   ;;  %s996_s1 = inlined_call_operand.hbm [shape: f32[8,128], index: 1, kind: input, shape index: {}]   ;;  %s997_s2 = inlined_call_operand.hbm [shape: f32[128,128], index: 2, kind: input, shape index: {}]   ;;  %s998_s3 = inlined_call_operand.vmem [shape: f32[1,128], index: 3, kind: input, shape index: {}]   ;;  %s999_s4 = inlined_call_operand.hbm [shape: f32[128,128], index: 4, kind: input, shape index: {}]   ;;  %s1000_s5 = inlined_call_operand.vmem [shape: f32[1,128], index: 5, kind: input, shape index: {}]   ;;  %s1001_s6 = inlined_call_operand.vmem [shape: f32[1,128], index: 6, kind: input, shape index: {}]   ;;  %s1002_s7 = inlined_call_operand.hbm [shape: f32[1,8,128], index: 7, kind: output, shape index: {}]  }
   0x1   :  { %13 = vsyncpa [#allocation6], 0 }
   0x2   :  { %14 = vsyncpa [#allocation9], 0 }
   0x3   :  { %15 = vsyncpa [#allocation4], 0  ;;  %s879_s24 = smov [#allocation5]   ;;  %s880_s26 = smov [#allocation2]  }
   0x4   :  { %s32_s25 = sshll.u32 %s879_s24, 4  ;;  %s22_s27 = sshll.u32 %s880_s26, 4  ;;  %s33_s25 = int_to_ptr.vmem [resolvable:$true] %s32_s25  ;;  %s23_s27 = int_to_ptr.vmem [resolvable:$true] %s22_s27 }
   0x5   :  { %s779_s28 = scalar_lea.vmem %s33_s25, 128  ;;  %p784_p1 = scmp.lt.s32.totalorder %s33_s25, %s33_s25 }
   0x6   :  { %p780_p0 = scmp.ne.s32.totalorder %s33_s25, %s779_s28  ;;  %p785_p2 = scmp.lt.s32.totalorder %s779_s28, %s779_s28 }
   0x8   :  { %p786_p3 = por %p785_p2, %p784_p1 }
   0xa   :  { %p787_p4 = pnand %p786_p3, %p780_p0 }
   0xc   :  { %790 = shalt.err (!%p787_p4)
}
   0xd   :  { %35 = dma.hbm_to_vmem [thread:$0]  %s996_s1, 128, %s33_s25, [#allocation6]  }
   0xe   :  { %s799_s8 = scalar_lea.vmem %s23_s27, 128  ;;  %p804_p6 = scmp.lt.s32.totalorder %s23_s27, %s23_s27 }
   0xf   :  { %p800_p5 = scmp.ne.s32.totalorder %s23_s27, %s799_s8  ;;  %p805_p7 = scmp.lt.s32.totalorder %s799_s8, %s799_s8 }
  0x11   :  { %p806_p8 = por %p805_p7, %p804_p6 }
  0x13   :  { %p807_p9 = pnand %p806_p8, %p800_p5 }
  0x15   :  { %810 = shalt.err (!%p807_p9)
}
  0x16   :  { %25 = dma.hbm_to_vmem [thread:$0]  %s995_s0, 128, %s23_s27, [#allocation3]  }
  0x17   :  { %s881_s11 = smov [#allocation7]  }
  0x18   :  { %s41_s12 = sshll.u32 %s881_s11, 4  ;;  %s42_s12 = int_to_ptr.vmem [resolvable:$true] %s41_s12 }
  0x19   :  { %s819_s13 = scalar_lea.vmem %s42_s12, 2048  ;;  %p824_p11 = scmp.lt.s32.totalorder %s42_s12, %s42_s12 }
  0x1a   :  { %p820_p10 = scmp.ne.s32.totalorder %s42_s12, %s819_s13  ;;  %p825_p12 = scmp.lt.s32.totalorder %s819_s13, %s819_s13 }
  0x1c   :  { %p826_p13 = por %p825_p12, %p824_p11 }
  0x1e   :  { %p827_p0 = pnand %p826_p13, %p820_p10 }
  0x20   :  { %830 = shalt.err (!%p827_p0)
}
  0x21   :  { %s882_s1 = smov 128   ;;  %s883_s14 = smov 8  }
  0x22   :  { %47 = dma.hbm_to_vmem [thread:$0]  %s997_s2, 2048, %s42_s12, [#allocation6], %s882_s1, %s882_s1, %s883_s14  }
  0x23   :  { %s884_s17 = smov [#allocation8]  }
  0x24   :  { %s55_s18 = sshll.u32 %s884_s17, 4  ;;  %s56_s18 = int_to_ptr.vmem [resolvable:$true] %s55_s18 }
  0x25   :  { %s839_s0 = scalar_lea.vmem %s56_s18, 2048  ;;  %p844_p2 = scmp.lt.s32.totalorder %s56_s18, %s56_s18 }
  0x26   :  { %p840_p1 = scmp.ne.s32.totalorder %s56_s18, %s839_s0  ;;  %p845_p3 = scmp.lt.s32.totalorder %s839_s0, %s839_s0 }
  0x28   :  { %p846_p4 = por %p845_p3, %p844_p2 }
  0x2a   :  { %p847_p5 = pnand %p846_p4, %p840_p1 }
  0x2c   :  { %850 = shalt.err (!%p847_p5)
}
  0x2d   :  { %61 = dma.hbm_to_vmem [thread:$0]  %s999_s4, 2048, %s56_s18, [#allocation9], %s882_s1, %s882_s1, %s883_s14  }
  0x2e   :  { %871 = dma.done.wait [#allocation3], 128  }
  0x2f   :  { %872 = vsyncadd [#allocation3], 4294967168 }
  0x30   :  { %873 = dma.done.wait [#allocation6], 2176  }
  0x31   :  { %874 = vsyncadd [#allocation6], 4294965120 }
  0x32   :  { %875 = dma.done.wait [#allocation9], 2048  }
  0x33   :  { %876 = vsyncadd [#allocation9], 4294965248  ;;  %v885_v0 = vmov 1966171168   ;;  %v84_v2 = vlaneseq  ;;  %v201_v5 = vld [vmem:[#allocation7 + $0x78] sm:$0xff]  ;;  %v200_v6 = vld [vmem:[#allocation7 + $0x70] sm:$0xff] }
  0x34   :  { %v82_v1 = vunpack.c.l.s4 %v885_v0  ;;  %670 = vmatprep.subr.mxu0 %v201_v5  ;;  %v199_v7 = vld [vmem:[#allocation7 + $0x68] sm:$0xff]  ;;  %v198_v9 = vld [vmem:[#allocation7 + $0x60] sm:$0xff]  ;;  %v78_v10 = vld [vmem:[#allocation2] sm:$0xff]  ;;  %vm542_vm0 = vcmask 1041409   ;;  %vm544_vm1 = vcmask 1042434   ;;  %vm546_vm2 = vcmask 1043459  }
  0x35   :  { %v940_v4 = vshrl.u32 %v84_v2, 7  ;;  %671 = vmatpush3.msra.mxu0 %v201_v5  ;;  %v197_v11 = vld [vmem:[#allocation7 + $0x58] sm:$0xff]  ;;  %v336_v15 = vld [vmem:[#allocation8 + $0x70] sm:$0xff]  ;;  %v195_v19 = vld [vmem:[#allocation7 + $0x48] sm:$0xff]  ;;  %v80_v24 = vcombine.high %v78_v10, %v78_v10  ;;  %vm548_vm3 = vcmask 1044484   ;;  %vm550_vm4 = vcmask 1045509  }
  0x36   :  { %v83_v3 = vunpack.c.0.s8 %v82_v1  ;;  %672 = vmatprep.subr.mxu0 %v200_v6  ;;  %v337_v14 = vld [vmem:[#allocation8 + $0x78] sm:$0xff]  ;;  %v196_v16 = vld [vmem:[#allocation7 + $0x50] sm:$0xff]  ;;  %v335_v21 = vld [vmem:[#allocation8 + $0x68] sm:$0xff]  ;;  %vm552_vm5 = vcmask 1046534   ;;  %vm554_vm6 = vcmask 1047559   ;;  %vm558_vm8 = vcmask 64512  }
  0x37   :  { %673 = vmatpush3.msra.mxu0 %v200_v6  ;;  %v947_v13 = vsub.s32 0, %v940_v4  ;;  %714 = vmatprep.subr.mxu1 %v337_v14  ;;  %v950_v18 = vld [vmem:[#allocation5] sm:$0xff]  ;;  %v194_v22 = vld [vmem:[#allocation7 + $0x40] sm:$0xff]  ;;  %v192_v29 = vld [vmem:[#allocation7 + $0x30] sm:$0xff]  ;;  %vm581_vm10 = vcmp.eq.s32.totalorder %v940_v4, 0 }
  0x38   :  { %v943_v8 = vsub.s32 %v83_v3, %v940_v4  ;;  %674 = vmatprep.subr.mxu0 %v199_v7  ;;  %715 = vmatpush3.msra.mxu1 %v337_v14  ;;  %v193_v26 = vld [vmem:[#allocation7 + $0x38] sm:$0xff]  ;;  %v334_v28 = vld [vmem:[#allocation8 + $0x60] sm:$0xff]  ;;  %v191_v33 = vld [vmem:[#allocation7 + $0x28] sm:$0xff] }
  0x39   :  { %675 = vmatpush3.msra.mxu0 %v199_v7  ;;  %716 = vmatprep.subr.mxu1 %v336_v15  ;;  %v333_v30 = vld [vmem:[#allocation8 + $0x58] sm:$0xff]  ;;  %v332_v35 = vld [vmem:[#allocation8 + $0x50] sm:$0xff]  ;;  %v190_v36 = vld [vmem:[#allocation7 + $0x20] sm:$0xff] }
  0x3a   :  { %v87_v12 = vrot.slane %v78_v10, %v943_v8  ;;  %676 = vmatprep.subr.mxu0 %v198_v9  ;;  %717 = vmatpush3.msra.mxu1 %v336_v15  ;;  %v94_v32 = vrot.slane %v80_v24, %v943_v8  ;;  %v331_v37 = vld [vmem:[#allocation8 + $0x48] sm:$0xff]  ;;  %v189_v41 = vld [vmem:[#allocation7 + $0x18] sm:$0xff]  ;;  %v330_v44 = vld [vmem:[#allocation8 + $0x40] sm:$0xff] }
  0x3b   :  { %677 = vmatpush3.msra.mxu0 %v198_v9  ;;  %718 = vmatprep.subr.mxu1 %v335_v21  ;;  %v188_v45 = vld [vmem:[#allocation7 + $0x10] sm:$0xff]  ;;  %v329_v46 = vld [vmem:[#allocation8 + $0x38] sm:$0xff]  ;;  %v187_v50 = vld [vmem:[#allocation7 + $0x8] sm:$0xff] }
  0x3c   :  { %v103_v17 = vrot.slane %v87_v12, %v943_v8  ;;  %678 = vmatprep.subr.mxu0 %v197_v11  ;;  %v95_v25 = vcombine.high %v87_v12, %v87_v12  ;;  %719 = vmatpush3.msra.mxu1 %v335_v21  ;;  %v96_v40 = vcombine.high %v94_v32, %v94_v32  ;;  %v328_v54 = vld [vmem:[#allocation8 + $0x30] sm:$0xff]  ;;  %v186_v55 = vld [vmem:[#allocation7] sm:$0xff]  ;;  %v327_v56 = vld [vmem:[#allocation8 + $0x28] sm:$0xff] }
  0x3d   :  { %679 = vmatpush3.msra.mxu0 %v197_v11  ;;  %720 = vmatprep.subr.mxu1 %v334_v28  ;;  %v110_v43 = vrot.slane %v94_v32, %v943_v8  ;;  %v326_v0 = vld [vmem:[#allocation8 + $0x20] sm:$0xff]  ;;  %v325_v12 = vld [vmem:[#allocation8 + $0x18] sm:$0xff]  ;;  %v323_v14 = vld [vmem:[#allocation8 + $0x8] sm:$0xff] }
  0x3e   :  { %v133_v20 = vrot.slane %v103_v17, %v947_v13  ;;  %680 = vmatprep.subr.mxu0 %v196_v16  ;;  %v117_v31 = vrot.slane %v95_v25, %v943_v8  ;;  %v125_v34 = vcombine.high %v103_v17, %v103_v17  ;;  %721 = vmatpush3.msra.mxu1 %v334_v28  ;;  %v322_v15 = vld [vmem:[#allocation8] sm:$0xff] }
  0x3f   :  { %681 = vmatpush3.msra.mxu0 %v196_v16  ;;  %722 = vmatprep.subr.mxu1 %v333_v30  ;;  %v124_v49 = vrot.slane %v96_v40, %v943_v8  ;;  %v149_v52 = vrot.slane %v110_v43, %v947_v13  ;;  %v126_v53 = vcombine.high %v110_v43, %v110_v43  ;;  %v619_v16 = vld [vmem:[%s998_s3] ss:$0 sm:$0xff] }
  0x40   :  { %v170_v23 = vadd.f32 %v133_v20, %v950_v18  ;;  %682 = vmatprep.subr.mxu0 %v195_v19  ;;  %723 = vmatpush3.msra.mxu1 %v333_v30  ;;  %v137_v38 = vrot.slane %v117_v31, %v947_v13  ;;  %v127_v39 = vcombine.high %v117_v31, %v117_v31 }
  0x41   :  { %683 = vmatpush3.msra.mxu0 %v195_v19  ;;  %724 = vmatprep.subr.mxu1 %v332_v35  ;;  %v141_v42 = vrot.slane %v125_v34, %v947_v13  ;;  %v153_v59 = vrot.slane %v124_v49, %v947_v13  ;;  %v128_v60 = vcombine.high %v124_v49, %v124_v49 }
  0x42   :  { %v178_v27 = vmax.f32 %v170_v23, 0.0  ;;  %684 = vmatprep.subr.mxu0 %v194_v22  ;;  %725 = vmatpush3.msra.mxu1 %v332_v35  ;;  %v171_v47 = vadd.f32 %v137_v38, %v950_v18  ;;  %v145_v48 = vrot.slane %v127_v39, %v947_v13  ;;  %v174_v62 = vadd.f32 %v149_v52, %v950_v18 }
  0x43   :  { %685 = vmatpush3.msra.mxu0 %v194_v22  ;;  %726 = vmatprep.subr.mxu1 %v331_v37  ;;  %v172_v51 = vadd.f32 %v141_v42, %v950_v18  ;;  %v157_v63 = vrot.slane %v126_v53, %v947_v13  ;;  %v175_v3 = vadd.f32 %v153_v59, %v950_v18 }
  0x44   :  { %702 = vmatprep.mubr.f32.mxu0 %v178_v27  ;;  %686 = vmatprep.subr.mxu0 %v193_v26  ;;  %v179_v57 = vmax.f32 %v171_v47, 0.0  ;;  %v173_v58 = vadd.f32 %v145_v48, %v950_v18  ;;  %v161_v5 = vrot.slane %v128_v60, %v947_v13  ;;  %v182_v6 = vmax.f32 %v174_v62, 0.0  ;;  %v324_v13 = vld [vmem:[#allocation8 + $0x10] sm:$0xff] }
  0x45   :  { %687 = vmatpush3.msra.mxu0 %v193_v26  ;;  %727 = vmatpush3.msra.mxu1 %v331_v37  ;;  %v180_v61 = vmax.f32 %v172_v51, 0.0  ;;  %v176_v7 = vadd.f32 %v157_v63, %v950_v18  ;;  %v183_v8 = vmax.f32 %v175_v3, 0.0 }
  0x46   :  { %688 = vmatprep.subr.mxu0 %v192_v29  ;;  %728 = vmatprep.subr.mxu1 %v330_v44  ;;  %v181_v1 = vmax.f32 %v173_v58, 0.0  ;;  %v177_v9 = vadd.f32 %v161_v5, %v950_v18 }
  0x47   :  { %689 = vmatpush3.msra.mxu0 %v192_v29  ;;  %729 = vmatpush3.msra.mxu1 %v330_v44  ;;  %v184_v10 = vmax.f32 %v176_v7, 0.0 }
  0x48   :  { %690 = vmatprep.subr.mxu0 %v191_v33  ;;  %730 = vmatprep.subr.mxu1 %v329_v46  ;;  %v185_v11 = vmax.f32 %v177_v9, 0.0 }
  0x49   :  { %691 = vmatpush3.msra.mxu0 %v191_v33  ;;  %731 = vmatpush3.msra.mxu1 %v329_v46 }
  0x4a   :  { %692 = vmatprep.subr.mxu0 %v190_v36  ;;  %732 = vmatprep.subr.mxu1 %v328_v54 }
  0x4b   :  { %693 = vmatpush3.msra.mxu0 %v190_v36  ;;  %733 = vmatpush3.msra.mxu1 %v328_v54 }
  0x4c   :  { %694 = vmatprep.subr.mxu0 %v189_v41  ;;  %734 = vmatprep.subr.mxu1 %v327_v56 }
  0x4d   :  { %695 = vmatpush3.msra.mxu0 %v189_v41  ;;  %735 = vmatpush3.msra.mxu1 %v327_v56  ;;  %v620_v41 = vld [vmem:[%s1000_s5] ss:$0 sm:$0xff] }
  0x4e   :  { %696 = vmatprep.subr.mxu0 %v188_v45  ;;  %736 = vmatprep.subr.mxu1 %v326_v0 }
  0x4f   :  { %697 = vmatpush3.msra.mxu0 %v188_v45  ;;  %737 = vmatpush3.msra.mxu1 %v326_v0  ;;  %v621_v45 = vld [vmem:[%s1001_s6] ss:$0 sm:$0xff]  ;;  %s886_s6 = smov [#allocation10]  }
  0x50   :  { %698 = vmatprep.subr.mxu0 %v187_v50  ;;  %738 = vmatprep.subr.mxu1 %v325_v12  ;;  %s608_s24 = sshll.u32 %s886_s6, 4  ;;  %s609_s24 = int_to_ptr.vmem [resolvable:$true] %s608_s24 }
  0x51   :  { %699 = vmatpush3.msra.mxu0 %v187_v50  ;;  %739 = vmatpush3.msra.mxu1 %v325_v12  ;;  %s851_s26 = scalar_lea.vmem %s609_s24, 128  ;;  %p856_p7 = scmp.lt.s32.totalorder %s609_s24, %s609_s24 }
  0x52   :  { %700 = vmatprep.subr.mxu0 %v186_v55  ;;  %740 = vmatprep.subr.mxu1 %v324_v13  ;;  %p852_p6 = scmp.ne.s32.totalorder %s609_s24, %s851_s26  ;;  %p857_p8 = scmp.lt.s32.totalorder %s851_s26, %s851_s26 }
  0x53   :  { %701 = vmatpush3.msra.mxu0 %v186_v55  ;;  %741 = vmatpush3.msra.mxu1 %v324_v13  ;;  %v982_v13 = vand.u32 127, %v84_v2 }
  0x54   :  { %703 = vmatmul.mubr.f32.vlgmr.msra.gmra.mxu0 %v179_v57  ;;  %742 = vmatprep.subr.mxu1 %v323_v14  ;;  %p858_p9 = por %p857_p8, %p856_p7 }
  0x55   :  { %705 = vmatprep.mubr.f32.mxu0 %v180_v61  ;;  %743 = vmatpush3.msra.mxu1 %v323_v14  ;;  %vm500_vm7 = vcmp.lt.s32.totalorder %v982_v13, 8  ;;  %vm569_vm9 = vcmp.eq.s32.totalorder %v940_v4, %v982_v13  ;;  %vm584_vm11 = vcmp.eq.s32.totalorder %v982_v13, 1  ;;  %vm582_vm12 = vcmp.eq.s32.totalorder %v982_v13, 0 }
  0x56   :  { %744 = vmatprep.subr.mxu1 %v322_v15  ;;  %vm585_vm13 = vmand %vm581_vm10, %vm584_vm11  ;;  %p859_p10 = pnand %p858_p9, %p852_p6 }
  0x57   :  { %745 = vmatpush3.msra.mxu1 %v322_v15  ;;  %v512_v15 = vsub.s32 %v982_v13, %v940_v4  ;;  %vm583_vm14 = vmand %vm581_vm10, %vm582_vm12 }
  0x58   :  { %706 = vmatmul.mubr.f32.gmra.mxu0 %v181_v1 }
  0x59   :  { %708 = vmatprep.mubr.f32.mxu0 %v182_v6 }
  0x5c   :  { %709 = vmatmul.mubr.f32.gmra.mxu0 %v183_v8 }
  0x5d   :  { %711 = vmatprep.mubr.f32.mxu0 %v184_v10 }
  0x60   :  { %712 = vmatmul.mubr.f32.gmra.mxu0 %v185_v11 }
 0x114   :  { %v704_v17 = vpop.f32.mrf.mxu0 }
 0x115   :  { %v281_v18 = vadd.f32 %v704_v17, %v619_v16 }
 0x116   :  { %v275_v19 = vpop.f32.mrf.mxu0 }
 0x117   :  { %v276_v20 = vadd.f32 %v619_v16, %v275_v19  ;;  %v315_v23 = vmax.f32 %v281_v18, 0.0 }
 0x118   :  { %v707_v21 = vpop.f32.mrf.mxu0 }
 0x119   :  { %v314_v22 = vmax.f32 %v276_v20, 0.0  ;;  %v291_v24 = vadd.f32 %v707_v21, %v619_v16 }
 0x11a   :  { %v285_v25 = vpop.f32.mrf.mxu0 }
 0x11b   :  { %v286_v26 = vadd.f32 %v619_v16, %v285_v25  ;;  %746 = vmatprep.mubr.f32.mxu1 %v314_v22  ;;  %v317_v29 = vmax.f32 %v291_v24, 0.0 }
 0x11c   :  { %v710_v27 = vpop.f32.mrf.mxu0  ;;  %747 = vmatmul.mubr.f32.vlgmr.msra.gmra.mxu1 %v315_v23 }
 0x11d   :  { %v316_v28 = vmax.f32 %v286_v26, 0.0  ;;  %v301_v30 = vadd.f32 %v710_v27, %v619_v16 }
 0x11e   :  { %v295_v31 = vpop.f32.mrf.mxu0 }
 0x11f   :  { %v296_v32 = vadd.f32 %v619_v16, %v295_v31  ;;  %749 = vmatprep.mubr.f32.mxu1 %v316_v28  ;;  %v319_v35 = vmax.f32 %v301_v30, 0.0 }
 0x120   :  { %v713_v33 = vpop.f32.mrf.mxu0  ;;  %750 = vmatmul.mubr.f32.gmra.mxu1 %v317_v29 }
 0x121   :  { %v318_v34 = vmax.f32 %v296_v32, 0.0  ;;  %v311_v36 = vadd.f32 %v713_v33, %v619_v16 }
 0x122   :  { %v305_v37 = vpop.f32.mrf.mxu0 }
 0x123   :  { %v306_v38 = vadd.f32 %v619_v16, %v305_v37  ;;  %752 = vmatprep.mubr.f32.mxu1 %v318_v34  ;;  %v321_v40 = vmax.f32 %v311_v36, 0.0 }
 0x124   :  { %753 = vmatmul.mubr.f32.gmra.mxu1 %v319_v35 }
 0x125   :  { %v320_v39 = vmax.f32 %v306_v38, 0.0 }
 0x127   :  { %755 = vmatprep.mubr.f32.mxu1 %v320_v39 }
 0x128   :  { %756 = vmatmul.mubr.f32.gmra.mxu1 %v321_v40 }
 0x1dc   :  { %v748_v42 = vpop.f32.mrf.mxu1 }
 0x1dd   :  { %v417_v43 = vadd.f32 %v748_v42, %v620_v41 }
 0x1de   :  { %v411_v44 = vpop.f32.mrf.mxu1 }
 0x1df   :  { %v451_v46 = vmax.f32 %v417_v43, 0.0  ;;  %v412_v47 = vadd.f32 %v620_v41, %v411_v44 }
 0x1e0   :  { %v751_v48 = vpop.f32.mrf.mxu1 }
 0x1e1   :  { %v450_v49 = vmax.f32 %v412_v47, 0.0  ;;  %v427_v50 = vadd.f32 %v751_v48, %v620_v41  ;;  %v466_v51 = vmul.f32 %v621_v45, %v451_v46 }
 0x1e2   :  { %v421_v52 = vpop.f32.mrf.mxu1 }
 0x1e3   :  { %v453_v53 = vmax.f32 %v427_v50, 0.0  ;;  %v422_v54 = vadd.f32 %v620_v41, %v421_v52  ;;  %475 = vadd.xlane.f32.xlu0 %v466_v51  ;;  %v465_v58 = vmul.f32 %v621_v45, %v450_v49 }
 0x1e4   :  { %v754_v55 = vpop.f32.mrf.mxu1 }
 0x1e5   :  { %v452_v56 = vmax.f32 %v422_v54, 0.0  ;;  %v437_v57 = vadd.f32 %v754_v55, %v620_v41  ;;  %v468_v59 = vmul.f32 %v621_v45, %v453_v53 }
 0x1e6   :  { %v431_v60 = vpop.f32.mrf.mxu1 }
 0x1e7   :  { %v432_v61 = vadd.f32 %v620_v41, %v431_v60  ;;  %473 = vadd.xlane.f32.xlu0 %v465_v58  ;;  %479 = vadd.xlane.f32.xlu1 %v468_v59  ;;  %v455_v63 = vmax.f32 %v437_v57, 0.0  ;;  %v467_v3 = vmul.f32 %v621_v45, %v452_v56 }
 0x1e8   :  { %v757_v62 = vpop.f32.mrf.mxu1 }
 0x1e9   :  { %v454_v0 = vmax.f32 %v432_v61, 0.0  ;;  %v447_v1 = vadd.f32 %v757_v62, %v620_v41  ;;  %v470_v10 = vmul.f32 %v621_v45, %v455_v63 }
 0x1ea   :  { %v441_v5 = vpop.f32.mrf.mxu1 }
 0x1eb   :  { %v442_v6 = vadd.f32 %v620_v41, %v441_v5  ;;  %477 = vadd.xlane.f32.xlu1 %v467_v3  ;;  %v469_v7 = vmul.f32 %v621_v45, %v454_v0  ;;  %v457_v8 = vmax.f32 %v447_v1, 0.0 }
 0x1ed   :  { %v456_v9 = vmax.f32 %v442_v6, 0.0  ;;  %481 = vadd.xlane.f32.xlu0 %v469_v7  ;;  %v472_v12 = vmul.f32 %v621_v45, %v457_v8 }
 0x1ef   :  { %483 = vadd.xlane.f32.xlu1 %v470_v10  ;;  %v471_v11 = vmul.f32 %v621_v45, %v456_v9 }
 0x1f1   :  { %485 = vadd.xlane.f32.xlu0 %v471_v11 }
 0x1f3   :  { %487 = vadd.xlane.f32.xlu1 %v472_v12 }
 0x26c   :  { %v476_v14 = vpop.xlane.xlu0 %475 }
 0x26d   :  { %v517_v19 = vrot.slane %v476_v14, %v512_v15 }
 0x270   :  { %v474_v16 = vpop.xlane.xlu0 %473  ;;  %v480_v17 = vpop.xlane.xlu1 %479 }
 0x271   :  { %v513_v18 = vrot.slane %v474_v16, %v512_v15  ;;  %v525_v23 = vrot.slane %v480_v17, %v512_v15 }
 0x273   :  { %v543_v22 = vsel %vm542_vm0, %v517_v19, %v513_v18 }
 0x274   :  { %v478_v20 = vpop.xlane.xlu1 %477 }
 0x275   :  { %v521_v21 = vrot.slane %v478_v20, %v512_v15 }
 0x276   :  { %v482_v24 = vpop.xlane.xlu0 %481 }
 0x277   :  { %v545_v25 = vsel %vm544_vm1, %v521_v21, %v543_v22  ;;  %v529_v2 = vrot.slane %v482_v24, %v512_v15 }
 0x278   :  { %v547_v26 = vsel %vm546_vm2, %v525_v23, %v545_v25  ;;  %v484_v27 = vpop.xlane.xlu1 %483 }
 0x279   :  { %v549_v28 = vsel %vm548_vm3, %v529_v2, %v547_v26  ;;  %v533_v29 = vrot.slane %v484_v27, %v512_v15 }
 0x27a   :  { %v486_v30 = vpop.xlane.xlu0 %485 }
 0x27b   :  { %v551_v31 = vsel %vm550_vm4, %v533_v29, %v549_v28  ;;  %v537_v32 = vrot.slane %v486_v30, %v512_v15 }
 0x27c   :  { %v488_v33 = vpop.xlane.xlu1 %487 }
 0x27d   :  { %v541_v34 = vrot.slane %v488_v33, %v512_v15  ;;  %v553_v35 = vsel %vm552_vm5, %v537_v32, %v551_v31 }
 0x27f   :  { %v555_v36 = vsel %vm554_vm6, %v541_v34, %v553_v35 }
 0x280   :  { %v557_v37 = vsel %vm500_vm7, %v555_v36, 0.0 }
 0x281   :  { %v559_v38 = vsel %vm558_vm8, %v557_v37, 0.0  ;;  %v570_v39 = vsel %vm569_vm9, %v557_v37, 0.0 }
 0x282   :  { %560 = vadd.xlane.f32.xlu0 %v559_v38  ;;  %v571_v40 = vsel %vm558_vm8, %v570_v39, 0.0 }
 0x283   :  { %572 = vadd.xlane.f32.xlu1 %v571_v40 }
 0x30b   :  { %v561_v41 = vpop.xlane.xlu0 %560 }
 0x30c   :  { %v562_v42 = vrot.slane %v561_v41, 4  ;;  %v573_v43 = vpop.xlane.xlu1 %572 }
 0x30d   :  { %v574_v44 = vrot.slane %v573_v43, 4 }
 0x30e   :  { %v563_v45 = vadd.f32 %v562_v42, %v561_v41 }
 0x30f   :  { %v575_v46 = vadd.f32 %v574_v44, %v573_v43 }
 0x310   :  { %v564_v47 = vrot.slane %v563_v45, 2 }
 0x311   :  { %v576_v48 = vrot.slane %v575_v46, 2 }
 0x312   :  { %v565_v49 = vadd.f32 %v564_v47, %v563_v45 }
 0x313   :  { %v577_v50 = vadd.f32 %v576_v48, %v575_v46 }
 0x314   :  { %v566_v51 = vrot.slane %v565_v49, 1 }
 0x315   :  { %v578_v52 = vrot.slane %v577_v50, 1 }
 0x316   :  { %v567_v53 = vadd.f32 %v566_v51, %v565_v49 }
 0x317   :  { %v579_v54 = vadd.f32 %v578_v52, %v577_v50 }
 0x318   :  { %758 = vpush %v567_v53 }
 0x319   :  { %760 = vpush %v579_v54 }
 0x349   :  { %s759_s5 = spop %758 }
 0x34a   :  { %s761_s25 = spop %760  ;;  %v588_v56 = vstv %s759_s5 }
 0x34b   :  { %v586_v55 = vstv %s761_s25 }
 0x34c   :  { %v587_v57 = vsel %vm585_vm13, %v586_v55, 0.0 }
 0x34d   :  { %v589_v58 = vsel %vm583_vm14, %v588_v56, %v587_v57 }
 0x34e   :  { %594 = vst [vmem:[#allocation10] sm:$0xff] %v589_v58 }
 0x34f   :  { %862 = shalt.err (!%p859_p10)
}
 0x350   :  { %611 = dma.vmem_to_hbm [thread:$0]  %s609_s24, 128, %s1002_s7, [#allocation4]  }
 0x351   :  { %877 = dma.done.wait [#allocation4], 128  }
 0x352   :  { %878 = vsyncadd [#allocation4], 4294967168 }
 0x353   :  { %615 = vsyncpa [#allocation3], 1 }
 0x354   :  { %616 = vsyncpa [#allocation6], 1 }
 0x355   :  { %617 = vsyncpa [#allocation9], 1 }
 0x356   :  { %618 = vsyncpa [#allocation4], 1 }

</bundles_post_ra>
